<compile_context>
chip_gen: v6e
topology: v6e:2x2x1
jax: 0.10.0
libtpu: 0.0.40
codegen_flags: <defaults>
</compile_context>

<pallas_src>
import jax
import jax.numpy as jnp
from jax.experimental import pallas as pl
from jax.experimental.pallas import tpu as pltpu

SEG_ALIGN = 16            # bf16 sublane tile rows
SLAB_DTYPE = jnp.bfloat16


def _round_up(x, m):
    return ((x + m - 1) // m) * m


def make_rdb5c_kernel(nf, gc, L, nf_p, gc_p):
    """Build the kernel for static (nf, gc, L) and padded segment sizes."""

    def kernel(x_ref,
               w1, b1, w2, b2, w3, b3, w4, b4, w5, b5,
               o_ref, act):
        # --- zero the slab padding rows (static, only if padding exists) ---
        # Done every step so the kernel carries no state across grid steps
        # (safe with "parallel" grid sharding on v7x).
        if nf_p != nf:
            act[pl.ds(nf, nf_p - nf), :] = jnp.zeros((nf_p - nf, L), SLAB_DTYPE)
        if gc_p != gc:
            for j in range(4):
                off = nf_p + j * gc_p + gc
                act[pl.ds(off, gc_p - gc), :] = jnp.zeros((gc_p - gc, L),
                                                          SLAB_DTYPE)

        # Boundary masks reproducing the conv's zero padding after the rolls.
        lane = jax.lax.broadcasted_iota(jnp.int32, (1, L), 1)
        keep_first = (lane != 0).astype(jnp.float32)      # zero col l == 0
        keep_last = (lane != L - 1).astype(jnp.float32)   # zero col l == L-1

        def conv(w_ref, b_ref, kin, cout):
            # One fused matmul: (3*Cout, Kin) @ (Kin, L) -> (3*Cout, L) f32.
            y = jnp.dot(w_ref[...], act[pl.ds(0, kin), :],
                        preferred_element_type=jnp.float32)
            g0 = y[0:cout, :]              # tap k=0  -> needs x[l-1]
            g1 = y[cout:2 * cout, :]       # tap k=1  -> x[l]
            g2 = y[2 * cout:3 * cout, :]   # tap k=2  -> needs x[l+1]
            left = pltpu.roll(g0, shift=1, axis=1) * keep_first
            right = pltpu.roll(g2, shift=L - 1, axis=1) * keep_last
            return left + g1 + right + b_ref[...]

        def lrelu(t):
            return jnp.maximum(t, 0.2 * t)

        # Dense chain.  Activations are cast to bf16 only at the slab store.
        act[pl.ds(0, nf), :] = x_ref[...].astype(SLAB_DTYPE)
        x1 = lrelu(conv(w1, b1, nf_p, gc))
        act[pl.ds(nf_p, gc), :] = x1.astype(SLAB_DTYPE)
        x2 = lrelu(conv(w2, b2, nf_p + gc_p, gc))
        act[pl.ds(nf_p + gc_p, gc), :] = x2.astype(SLAB_DTYPE)
        x3 = lrelu(conv(w3, b3, nf_p + 2 * gc_p, gc))
        act[pl.ds(nf_p + 2 * gc_p, gc), :] = x3.astype(SLAB_DTYPE)
        x4 = lrelu(conv(w4, b4, nf_p + 3 * gc_p, gc))
        act[pl.ds(nf_p + 3 * gc_p, gc), :] = x4.astype(SLAB_DTYPE)

        # conv5 weights/bias are pre-scaled by 0.2 on the host; re-read x from
        # x_ref for the residual (keeps f32 precision, avoids a long live range).
        x5s = conv(w5, b5, nf_p + 4 * gc_p, nf)
        o_ref[...] = x5s + x_ref[...]

    return kernel


def residual_dense_block_5c(x, packed_params, nf, gc):
    """x: (B, nf, L) f32 (native PyTorch layout); packed_params: 5x (W, b)."""
    B, _, L = x.shape
    nf_p = _round_up(nf, SEG_ALIGN)
    gc_p = _round_up(gc, SEG_ALIGN)

    kernel = make_rdb5c_kernel(nf, gc, L, nf_p, gc_p)

    # Batch as grid axis (squeezed) -> no host-side transposes, grid = (B,).
    in_specs = [pl.BlockSpec((None, nf, L), lambda b: (b, 0, 0))]
    args = [x]
    for w, bia in packed_params:
        in_specs.append(pl.BlockSpec(w.shape, lambda b: (0, 0)))
        in_specs.append(pl.BlockSpec(bia.shape, lambda b: (0, 0)))
        args += [w, bia]

    out = pl.pallas_call(
        kernel,
        out_shape=jax.ShapeDtypeStruct((B, nf, L), jnp.float32),
        grid_spec=pltpu.PrefetchScalarGridSpec(
            num_scalar_prefetch=0,
            grid=(B,),
            in_specs=in_specs,
            out_specs=pl.BlockSpec((None, nf, L), lambda b: (b, 0, 0)),
            scratch_shapes=[pltpu.VMEM((nf_p + 4 * gc_p, L), SLAB_DTYPE)],
        ),
        compiler_params=pltpu.CompilerParams(
            dimension_semantics=("parallel",)),
    )(*args)
    return out


def init_params(key, nf, gc, scale=0.1):
    """Kaiming-normal (fan_in) init scaled by `scale`, zero bias (PyTorch init)."""
    in_chs = [nf, nf + gc, nf + 2 * gc, nf + 3 * gc, nf + 4 * gc]
    out_chs = [gc, gc, gc, gc, nf]
    raw = []
    for cin, cout in zip(in_chs, out_chs):
        key, wk = jax.random.split(key)
        fan_in = cin * 3
        std = (2.0 / fan_in) ** 0.5
        w = jax.random.normal(wk, (cout, cin, 3), jnp.float32) * std * scale
        b = jnp.zeros((cout,), jnp.float32)
        raw.append((w, b))
    return raw


def pack_params(raw_params, nf, gc):
    """Pack PyTorch-layout (Cout, Cin, 3) weights for the kernel:
      - taps stacked along the OUTPUT dim -> (3*Cout, Kin_padded)
      - zero columns inserted so every input segment is SEG_ALIGN-row aligned
      - layer-5 weight & bias pre-scaled by the 0.2 residual factor
      - weights bf16, bias kept f32 as a (Cout, 1) column."""
    nf_p = _round_up(nf, SEG_ALIGN)
    gc_p = _round_up(gc, SEG_ALIGN)
    packed = []
    for i, (w, b) in enumerate(raw_params):
        cout = w.shape[0]
        seg_sizes = [nf] + [gc] * i
        seg_pads = [nf_p] + [gc_p] * i
        out_scale = 0.2 if i == 4 else 1.0
        taps = []
        for k in range(3):
            cols = []
            c0 = 0
            for s, p in zip(seg_sizes, seg_pads):
                wk = w[:, c0:c0 + s, k]
                if p > s:
                    wk = jnp.concatenate(
                        [wk, jnp.zeros((cout, p - s), w.dtype)], axis=1)
                cols.append(wk)
                c0 += s
            taps.append(jnp.concatenate(cols, axis=1))
        w_packed = (jnp.concatenate(taps, axis=0) * out_scale).astype(SLAB_DTYPE)
        b_col = (b * out_scale).reshape(cout, 1).astype(jnp.float32)
        packed.append((w_packed, b_col))
    return packed


# ---- plain-JAX f32 reference (for correctness check) ----
def _conv1d_ref(x, w, b):
    y = jax.lax.conv_general_dilated(
        x, w, window_strides=(1,), padding=((1, 1),),
        dimension_numbers=("NCH", "OIH", "NCH"))
    return y + b[None, :, None]


def reference(x, raw_params):
    lrelu = lambda t: jnp.where(t > 0, t, 0.2 * t)
    x1 = lrelu(_conv1d_ref(x, *raw_params[0]))
    x2 = lrelu(_conv1d_ref(jnp.concatenate([x, x1], 1), *raw_params[1]))
    x3 = lrelu(_conv1d_ref(jnp.concatenate([x, x1, x2], 1), *raw_params[2]))
    x4 = lrelu(_conv1d_ref(jnp.concatenate([x, x1, x2, x3], 1), *raw_params[3]))
    x5 = _conv1d_ref(jnp.concatenate([x, x1, x2, x3, x4], 1), *raw_params[4])
    return x5 * 0.2 + x


if __name__ == "__main__":
    B, nf, gc, L = 2, 16, 8, 128

    key = jax.random.PRNGKey(0)
    key, xk = jax.random.split(key)
    x = jax.random.normal(xk, (B, nf, L), jnp.float32)

    raw_params = init_params(key, nf, gc, scale=0.1)
    packed_params = pack_params(raw_params, nf, gc)

    out = residual_dense_block_5c(x, packed_params, nf, gc)
    out = jax.block_until_ready(out)

    ref = jax.block_until_ready(reference(x, raw_params))
    assert out.shape == (B, nf, L)
    # bf16 slab/weights with f32 accumulation -> loosened tolerance.
    assert jnp.allclose(out, ref, atol=2e-3, rtol=2e-3), (
        f"max abs err {jnp.max(jnp.abs(out - ref))}")

    print("KERNEL_OK")
</pallas_src>

<mosaic_0001>
module attributes {stable_mosaic.version = 11 : i64} {
  func.func @kernel(%arg0: i32, %arg1: memref<1x16x128xf32, #tpu.memory_space<vmem>>, %arg2: memref<24x16xbf16, #tpu.memory_space<vmem>>, %arg3: memref<8x1xf32, #tpu.memory_space<vmem>>, %arg4: memref<24x32xbf16, #tpu.memory_space<vmem>>, %arg5: memref<8x1xf32, #tpu.memory_space<vmem>>, %arg6: memref<24x48xbf16, #tpu.memory_space<vmem>>, %arg7: memref<8x1xf32, #tpu.memory_space<vmem>>, %arg8: memref<24x64xbf16, #tpu.memory_space<vmem>>, %arg9: memref<8x1xf32, #tpu.memory_space<vmem>>, %arg10: memref<48x80xbf16, #tpu.memory_space<vmem>>, %arg11: memref<16x1xf32, #tpu.memory_space<vmem>>, %arg12: memref<1x16x128xf32, #tpu.memory_space<vmem>>, %arg13: memref<80x128xbf16, #tpu.memory_space<vmem>>) attributes {dimension_semantics = [#tpu.dimension_semantics<parallel>], iteration_bounds = array<i64: 2>, scalar_prefetch = 0 : i64, scratch_operands = 1 : i64, tpu.core_type = #tpu.core_type<tc>, window_params = [{transform_indices = @transform_0, window_bounds = array<i64: 1, 16, 128>}, {pipeline_mode = #tpu.pipeline_mode<synchronous>, transform_indices = @transform_1, window_bounds = array<i64: 24, 16>}, {pipeline_mode = #tpu.pipeline_mode<synchronous>, transform_indices = @transform_2, window_bounds = array<i64: 8, 1>}, {pipeline_mode = #tpu.pipeline_mode<synchronous>, transform_indices = @transform_3, window_bounds = array<i64: 24, 32>}, {pipeline_mode = #tpu.pipeline_mode<synchronous>, transform_indices = @transform_4, window_bounds = array<i64: 8, 1>}, {pipeline_mode = #tpu.pipeline_mode<synchronous>, transform_indices = @transform_5, window_bounds = array<i64: 24, 48>}, {pipeline_mode = #tpu.pipeline_mode<synchronous>, transform_indices = @transform_6, window_bounds = array<i64: 8, 1>}, {pipeline_mode = #tpu.pipeline_mode<synchronous>, transform_indices = @transform_7, window_bounds = array<i64: 24, 64>}, {pipeline_mode = #tpu.pipeline_mode<synchronous>, transform_indices = @transform_8, window_bounds = array<i64: 8, 1>}, {pipeline_mode = #tpu.pipeline_mode<synchronous>, transform_indices = @transform_9, window_bounds = array<i64: 48, 80>}, {pipeline_mode = #tpu.pipeline_mode<synchronous>, transform_indices = @transform_10, window_bounds = array<i64: 16, 1>}, {transform_indices = @transform_11, window_bounds = array<i64: 1, 16, 128>}]} {
    %cst = arith.constant 0.000000e+00 : bf16
    %0 = vector.broadcast %cst : bf16 to vector<8x128xbf16>
    %c24 = arith.constant 24 : index
    %c0 = arith.constant 0 : index
    %1 = vector.load %arg13[%c24, %c0] : memref<80x128xbf16, #tpu.memory_space<vmem>>, vector<8x128xbf16>
    tpu.vector_store %arg13[%c24, %c0], %0 {strides = array<i32>} : memref<80x128xbf16, #tpu.memory_space<vmem>>, vector<8x128xbf16>,
    %cst_0 = arith.constant 0.000000e+00 : bf16
    %2 = vector.broadcast %cst_0 : bf16 to vector<8x128xbf16>
    %c40 = arith.constant 40 : index
    %c0_1 = arith.constant 0 : index
    %3 = vector.load %arg13[%c40, %c0_1] : memref<80x128xbf16, #tpu.memory_space<vmem>>, vector<8x128xbf16>
    tpu.vector_store %arg13[%c40, %c0_1], %2 {strides = array<i32>} : memref<80x128xbf16, #tpu.memory_space<vmem>>, vector<8x128xbf16>,
    %cst_2 = arith.constant 0.000000e+00 : bf16
    %4 = vector.broadcast %cst_2 : bf16 to vector<8x128xbf16>
    %c56 = arith.constant 56 : index
    %c0_3 = arith.constant 0 : index
    %5 = vector.load %arg13[%c56, %c0_3] : memref<80x128xbf16, #tpu.memory_space<vmem>>, vector<8x128xbf16>
    tpu.vector_store %arg13[%c56, %c0_3], %4 {strides = array<i32>} : memref<80x128xbf16, #tpu.memory_space<vmem>>, vector<8x128xbf16>,
    %cst_4 = arith.constant 0.000000e+00 : bf16
    %6 = vector.broadcast %cst_4 : bf16 to vector<8x128xbf16>
    %c72 = arith.constant 72 : index
    %c0_5 = arith.constant 0 : index
    %7 = vector.load %arg13[%c72, %c0_5] : memref<80x128xbf16, #tpu.memory_space<vmem>>, vector<8x128xbf16>
    tpu.vector_store %arg13[%c72, %c0_5], %6 {strides = array<i32>} : memref<80x128xbf16, #tpu.memory_space<vmem>>, vector<8x128xbf16>,
    %8 = tpu.iota {dimensions = array<i32: 1>} : vector<1x128xi32>
    %c0_i32 = arith.constant 0 : i32
    %9 = vector.broadcast %c0_i32 : i32 to vector<1x128xi32>
    %10 = arith.cmpi ne, %8, %9 : vector<1x128xi32>
    %11 = arith.extui %10 : vector<1x128xi1> to vector<1x128xi32>
    %12 = arith.sitofp %11 : vector<1x128xi32> to vector<1x128xf32>
    %c127_i32 = arith.constant 127 : i32
    %13 = vector.broadcast %c127_i32 : i32 to vector<1x128xi32>
    %14 = arith.cmpi ne, %8, %13 : vector<1x128xi32>
    %15 = arith.extui %14 : vector<1x128xi1> to vector<1x128xi32>
    %16 = arith.sitofp %15 : vector<1x128xi32> to vector<1x128xf32>
    %c0_6 = arith.constant 0 : index
    %c0_7 = arith.constant 0 : index
    %c0_8 = arith.constant 0 : index
    %17 = vector.load %arg1[%c0_6, %c0_7, %c0_8] : memref<1x16x128xf32, #tpu.memory_space<vmem>>, vector<1x16x128xf32>
    %18 = vector.shape_cast %17 : vector<1x16x128xf32> to vector<16x128xf32>
    %19 = arith.truncf %18 : vector<16x128xf32> to vector<16x128xbf16>
    %c0_9 = arith.constant 0 : index
    %c0_10 = arith.constant 0 : index
    %20 = vector.load %arg13[%c0_9, %c0_10] : memref<80x128xbf16, #tpu.memory_space<vmem>>, vector<16x128xbf16>
    tpu.vector_store %arg13[%c0_9, %c0_10], %19 {strides = array<i32>} : memref<80x128xbf16, #tpu.memory_space<vmem>>, vector<16x128xbf16>,
    %c0_11 = arith.constant 0 : index
    %c0_12 = arith.constant 0 : index
    %21 = vector.load %arg2[%c0_11, %c0_12] : memref<24x16xbf16, #tpu.memory_space<vmem>>, vector<24x16xbf16>
    %c0_13 = arith.constant 0 : index
    %c0_14 = arith.constant 0 : index
    %22 = vector.load %arg13[%c0_13, %c0_14] : memref<80x128xbf16, #tpu.memory_space<vmem>>, vector<16x128xbf16>
    %cst_15 = arith.constant dense<0.000000e+00> : vector<24x128xf32>
    %23 = tpu.matmul %21, %22, %cst_15 {dimension_numbers = #tpu.dot_dimension_numbers<[1], [0], [0], [1], [0, 0, 1, 1], [], []>} : vector<24x16xbf16>, vector<16x128xbf16>, vector<24x128xf32> -> vector<24x128xf32>
    %24 = vector.extract_strided_slice %23 {offsets = [0, 0], sizes = [8, 128], strides = [1, 1]} : vector<24x128xf32> to vector<8x128xf32>
    %25 = vector.extract_strided_slice %23 {offsets = [8, 0], sizes = [8, 128], strides = [1, 1]} : vector<24x128xf32> to vector<8x128xf32>
    %26 = vector.extract_strided_slice %23 {offsets = [16, 0], sizes = [8, 128], strides = [1, 1]} : vector<24x128xf32> to vector<8x128xf32>
    %c1_i32 = arith.constant 1 : i32
    %27 = tpu.dynamic_rotate %24 by %c1_i32 dim 1 : vector<8x128xf32>, i32 -> vector<8x128xf32>
    %28 = vector.broadcast %12 : vector<1x128xf32> to vector<8x128xf32>
    %29 = arith.mulf %27, %28 : vector<8x128xf32>
    %c127_i32_16 = arith.constant 127 : i32
    %30 = tpu.dynamic_rotate %26 by %c127_i32_16 dim 1 : vector<8x128xf32>, i32 -> vector<8x128xf32>
    %31 = vector.broadcast %16 : vector<1x128xf32> to vector<8x128xf32>
    %32 = arith.mulf %30, %31 : vector<8x128xf32>
    %33 = arith.addf %29, %25 : vector<8x128xf32>
    %34 = arith.addf %33, %32 : vector<8x128xf32>
    %c0_17 = arith.constant 0 : index
    %c0_18 = arith.constant 0 : index
    %35 = vector.load %arg3[%c0_17, %c0_18] : memref<8x1xf32, #tpu.memory_space<vmem>>, vector<8x1xf32>
    %36 = vector.broadcast %35 : vector<8x1xf32> to vector<8x128xf32>
    %37 = arith.addf %34, %36 : vector<8x128xf32>
    %cst_19 = arith.constant 2.000000e-01 : f32
    %38 = vector.broadcast %cst_19 : f32 to vector<8x128xf32>
    %39 = arith.mulf %38, %37 : vector<8x128xf32>
    %40 = arith.maximumf %37, %39 : vector<8x128xf32>
    %41 = arith.truncf %40 : vector<8x128xf32> to vector<8x128xbf16>
    %c16 = arith.constant 16 : index
    %c0_20 = arith.constant 0 : index
    %42 = vector.load %arg13[%c16, %c0_20] : memref<80x128xbf16, #tpu.memory_space<vmem>>, vector<8x128xbf16>
    tpu.vector_store %arg13[%c16, %c0_20], %41 {strides = array<i32>} : memref<80x128xbf16, #tpu.memory_space<vmem>>, vector<8x128xbf16>,
    %c0_21 = arith.constant 0 : index
    %c0_22 = arith.constant 0 : index
    %43 = vector.load %arg4[%c0_21, %c0_22] : memref<24x32xbf16, #tpu.memory_space<vmem>>, vector<24x32xbf16>
    %c0_23 = arith.constant 0 : index
    %c0_24 = arith.constant 0 : index
    %44 = vector.load %arg13[%c0_23, %c0_24] : memref<80x128xbf16, #tpu.memory_space<vmem>>, vector<32x128xbf16>
    %cst_25 = arith.constant dense<0.000000e+00> : vector<24x128xf32>
    %45 = tpu.matmul %43, %44, %cst_25 {dimension_numbers = #tpu.dot_dimension_numbers<[1], [0], [0], [1], [0, 0, 1, 1], [], []>} : vector<24x32xbf16>, vector<32x128xbf16>, vector<24x128xf32> -> vector<24x128xf32>
    %46 = vector.extract_strided_slice %45 {offsets = [0, 0], sizes = [8, 128], strides = [1, 1]} : vector<24x128xf32> to vector<8x128xf32>
    %47 = vector.extract_strided_slice %45 {offsets = [8, 0], sizes = [8, 128], strides = [1, 1]} : vector<24x128xf32> to vector<8x128xf32>
    %48 = vector.extract_strided_slice %45 {offsets = [16, 0], sizes = [8, 128], strides = [1, 1]} : vector<24x128xf32> to vector<8x128xf32>
    %c1_i32_26 = arith.constant 1 : i32
    %49 = tpu.dynamic_rotate %46 by %c1_i32_26 dim 1 : vector<8x128xf32>, i32 -> vector<8x128xf32>
    %50 = vector.broadcast %12 : vector<1x128xf32> to vector<8x128xf32>
    %51 = arith.mulf %49, %50 : vector<8x128xf32>
    %c127_i32_27 = arith.constant 127 : i32
    %52 = tpu.dynamic_rotate %48 by %c127_i32_27 dim 1 : vector<8x128xf32>, i32 -> vector<8x128xf32>
    %53 = vector.broadcast %16 : vector<1x128xf32> to vector<8x128xf32>
    %54 = arith.mulf %52, %53 : vector<8x128xf32>
    %55 = arith.addf %51, %47 : vector<8x128xf32>
    %56 = arith.addf %55, %54 : vector<8x128xf32>
    %c0_28 = arith.constant 0 : index
    %c0_29 = arith.constant 0 : index
    %57 = vector.load %arg5[%c0_28, %c0_29] : memref<8x1xf32, #tpu.memory_space<vmem>>, vector<8x1xf32>
    %58 = vector.broadcast %57 : vector<8x1xf32> to vector<8x128xf32>
    %59 = arith.addf %56, %58 : vector<8x128xf32>
    %cst_30 = arith.constant 2.000000e-01 : f32
    %60 = vector.broadcast %cst_30 : f32 to vector<8x128xf32>
    %61 = arith.mulf %60, %59 : vector<8x128xf32>
    %62 = arith.maximumf %59, %61 : vector<8x128xf32>
    %63 = arith.truncf %62 : vector<8x128xf32> to vector<8x128xbf16>
    %c32 = arith.constant 32 : index
    %c0_31 = arith.constant 0 : index
    %64 = vector.load %arg13[%c32, %c0_31] : memref<80x128xbf16, #tpu.memory_space<vmem>>, vector<8x128xbf16>
    tpu.vector_store %arg13[%c32, %c0_31], %63 {strides = array<i32>} : memref<80x128xbf16, #tpu.memory_space<vmem>>, vector<8x128xbf16>,
    %c0_32 = arith.constant 0 : index
    %c0_33 = arith.constant 0 : index
    %65 = vector.load %arg6[%c0_32, %c0_33] : memref<24x48xbf16, #tpu.memory_space<vmem>>, vector<24x48xbf16>
    %c0_34 = arith.constant 0 : index
    %c0_35 = arith.constant 0 : index
    %66 = vector.load %arg13[%c0_34, %c0_35] : memref<80x128xbf16, #tpu.memory_space<vmem>>, vector<48x128xbf16>
    %cst_36 = arith.constant dense<0.000000e+00> : vector<24x128xf32>
    %67 = tpu.matmul %65, %66, %cst_36 {dimension_numbers = #tpu.dot_dimension_numbers<[1], [0], [0], [1], [0, 0, 1, 1], [], []>} : vector<24x48xbf16>, vector<48x128xbf16>, vector<24x128xf32> -> vector<24x128xf32>
    %68 = vector.extract_strided_slice %67 {offsets = [0, 0], sizes = [8, 128], strides = [1, 1]} : vector<24x128xf32> to vector<8x128xf32>
    %69 = vector.extract_strided_slice %67 {offsets = [8, 0], sizes = [8, 128], strides = [1, 1]} : vector<24x128xf32> to vector<8x128xf32>
    %70 = vector.extract_strided_slice %67 {offsets = [16, 0], sizes = [8, 128], strides = [1, 1]} : vector<24x128xf32> to vector<8x128xf32>
    %c1_i32_37 = arith.constant 1 : i32
    %71 = tpu.dynamic_rotate %68 by %c1_i32_37 dim 1 : vector<8x128xf32>, i32 -> vector<8x128xf32>
    %72 = vector.broadcast %12 : vector<1x128xf32> to vector<8x128xf32>
    %73 = arith.mulf %71, %72 : vector<8x128xf32>
    %c127_i32_38 = arith.constant 127 : i32
    %74 = tpu.dynamic_rotate %70 by %c127_i32_38 dim 1 : vector<8x128xf32>, i32 -> vector<8x128xf32>
    %75 = vector.broadcast %16 : vector<1x128xf32> to vector<8x128xf32>
    %76 = arith.mulf %74, %75 : vector<8x128xf32>
    %77 = arith.addf %73, %69 : vector<8x128xf32>
    %78 = arith.addf %77, %76 : vector<8x128xf32>
    %c0_39 = arith.constant 0 : index
    %c0_40 = arith.constant 0 : index
    %79 = vector.load %arg7[%c0_39, %c0_40] : memref<8x1xf32, #tpu.memory_space<vmem>>, vector<8x1xf32>
    %80 = vector.broadcast %79 : vector<8x1xf32> to vector<8x128xf32>
    %81 = arith.addf %78, %80 : vector<8x128xf32>
    %cst_41 = arith.constant 2.000000e-01 : f32
    %82 = vector.broadcast %cst_41 : f32 to vector<8x128xf32>
    %83 = arith.mulf %82, %81 : vector<8x128xf32>
    %84 = arith.maximumf %81, %83 : vector<8x128xf32>
    %85 = arith.truncf %84 : vector<8x128xf32> to vector<8x128xbf16>
    %c48 = arith.constant 48 : index
    %c0_42 = arith.constant 0 : index
    %86 = vector.load %arg13[%c48, %c0_42] : memref<80x128xbf16, #tpu.memory_space<vmem>>, vector<8x128xbf16>
    tpu.vector_store %arg13[%c48, %c0_42], %85 {strides = array<i32>} : memref<80x128xbf16, #tpu.memory_space<vmem>>, vector<8x128xbf16>,
    %c0_43 = arith.constant 0 : index
    %c0_44 = arith.constant 0 : index
    %87 = vector.load %arg8[%c0_43, %c0_44] : memref<24x64xbf16, #tpu.memory_space<vmem>>, vector<24x64xbf16>
    %c0_45 = arith.constant 0 : index
    %c0_46 = arith.constant 0 : index
    %88 = vector.load %arg13[%c0_45, %c0_46] : memref<80x128xbf16, #tpu.memory_space<vmem>>, vector<64x128xbf16>
    %cst_47 = arith.constant dense<0.000000e+00> : vector<24x128xf32>
    %89 = tpu.matmul %87, %88, %cst_47 {dimension_numbers = #tpu.dot_dimension_numbers<[1], [0], [0], [1], [0, 0, 1, 1], [], []>} : vector<24x64xbf16>, vector<64x128xbf16>, vector<24x128xf32> -> vector<24x128xf32>
    %90 = vector.extract_strided_slice %89 {offsets = [0, 0], sizes = [8, 128], strides = [1, 1]} : vector<24x128xf32> to vector<8x128xf32>
    %91 = vector.extract_strided_slice %89 {offsets = [8, 0], sizes = [8, 128], strides = [1, 1]} : vector<24x128xf32> to vector<8x128xf32>
    %92 = vector.extract_strided_slice %89 {offsets = [16, 0], sizes = [8, 128], strides = [1, 1]} : vector<24x128xf32> to vector<8x128xf32>
    %c1_i32_48 = arith.constant 1 : i32
    %93 = tpu.dynamic_rotate %90 by %c1_i32_48 dim 1 : vector<8x128xf32>, i32 -> vector<8x128xf32>
    %94 = vector.broadcast %12 : vector<1x128xf32> to vector<8x128xf32>
    %95 = arith.mulf %93, %94 : vector<8x128xf32>
    %c127_i32_49 = arith.constant 127 : i32
    %96 = tpu.dynamic_rotate %92 by %c127_i32_49 dim 1 : vector<8x128xf32>, i32 -> vector<8x128xf32>
    %97 = vector.broadcast %16 : vector<1x128xf32> to vector<8x128xf32>
    %98 = arith.mulf %96, %97 : vector<8x128xf32>
    %99 = arith.addf %95, %91 : vector<8x128xf32>
    %100 = arith.addf %99, %98 : vector<8x128xf32>
    %c0_50 = arith.constant 0 : index
    %c0_51 = arith.constant 0 : index
    %101 = vector.load %arg9[%c0_50, %c0_51] : memref<8x1xf32, #tpu.memory_space<vmem>>, vector<8x1xf32>
    %102 = vector.broadcast %101 : vector<8x1xf32> to vector<8x128xf32>
    %103 = arith.addf %100, %102 : vector<8x128xf32>
    %cst_52 = arith.constant 2.000000e-01 : f32
    %104 = vector.broadcast %cst_52 : f32 to vector<8x128xf32>
    %105 = arith.mulf %104, %103 : vector<8x128xf32>
    %106 = arith.maximumf %103, %105 : vector<8x128xf32>
    %107 = arith.truncf %106 : vector<8x128xf32> to vector<8x128xbf16>
    %c64 = arith.constant 64 : index
    %c0_53 = arith.constant 0 : index
    %108 = vector.load %arg13[%c64, %c0_53] : memref<80x128xbf16, #tpu.memory_space<vmem>>, vector<8x128xbf16>
    tpu.vector_store %arg13[%c64, %c0_53], %107 {strides = array<i32>} : memref<80x128xbf16, #tpu.memory_space<vmem>>, vector<8x128xbf16>,
    %c0_54 = arith.constant 0 : index
    %c0_55 = arith.constant 0 : index
    %109 = vector.load %arg10[%c0_54, %c0_55] : memref<48x80xbf16, #tpu.memory_space<vmem>>, vector<48x80xbf16>
    %c0_56 = arith.constant 0 : index
    %c0_57 = arith.constant 0 : index
    %110 = vector.load %arg13[%c0_56, %c0_57] : memref<80x128xbf16, #tpu.memory_space<vmem>>, vector<80x128xbf16>
    %cst_58 = arith.constant dense<0.000000e+00> : vector<48x128xf32>
    %111 = tpu.matmul %109, %110, %cst_58 {dimension_numbers = #tpu.dot_dimension_numbers<[1], [0], [0], [1], [0, 0, 1, 1], [], []>} : vector<48x80xbf16>, vector<80x128xbf16>, vector<48x128xf32> -> vector<48x128xf32>
    %112 = vector.extract_strided_slice %111 {offsets = [0, 0], sizes = [16, 128], strides = [1, 1]} : vector<48x128xf32> to vector<16x128xf32>
    %113 = vector.extract_strided_slice %111 {offsets = [16, 0], sizes = [16, 128], strides = [1, 1]} : vector<48x128xf32> to vector<16x128xf32>
    %114 = vector.extract_strided_slice %111 {offsets = [32, 0], sizes = [16, 128], strides = [1, 1]} : vector<48x128xf32> to vector<16x128xf32>
    %c1_i32_59 = arith.constant 1 : i32
    %115 = tpu.dynamic_rotate %112 by %c1_i32_59 dim 1 : vector<16x128xf32>, i32 -> vector<16x128xf32>
    %116 = vector.broadcast %12 : vector<1x128xf32> to vector<16x128xf32>
    %117 = arith.mulf %115, %116 : vector<16x128xf32>
    %c127_i32_60 = arith.constant 127 : i32
    %118 = tpu.dynamic_rotate %114 by %c127_i32_60 dim 1 : vector<16x128xf32>, i32 -> vector<16x128xf32>
    %119 = vector.broadcast %16 : vector<1x128xf32> to vector<16x128xf32>
    %120 = arith.mulf %118, %119 : vector<16x128xf32>
    %121 = arith.addf %117, %113 : vector<16x128xf32>
    %122 = arith.addf %121, %120 : vector<16x128xf32>
    %c0_61 = arith.constant 0 : index
    %c0_62 = arith.constant 0 : index
    %123 = vector.load %arg11[%c0_61, %c0_62] : memref<16x1xf32, #tpu.memory_space<vmem>>, vector<16x1xf32>
    %124 = vector.broadcast %123 : vector<16x1xf32> to vector<16x128xf32>
    %125 = arith.addf %122, %124 : vector<16x128xf32>
    %c0_63 = arith.constant 0 : index
    %c0_64 = arith.constant 0 : index
    %c0_65 = arith.constant 0 : index
    %126 = vector.load %arg1[%c0_63, %c0_64, %c0_65] : memref<1x16x128xf32, #tpu.memory_space<vmem>>, vector<1x16x128xf32>
    %127 = vector.shape_cast %126 : vector<1x16x128xf32> to vector<16x128xf32>
    %128 = arith.addf %125, %127 : vector<16x128xf32>
    %c0_66 = arith.constant 0 : index
    %c0_67 = arith.constant 0 : index
    %c0_68 = arith.constant 0 : index
    %129 = vector.load %arg12[%c0_66, %c0_67, %c0_68] : memref<1x16x128xf32, #tpu.memory_space<vmem>>, vector<1x16x128xf32>
    %130 = vector.shape_cast %129 : vector<1x16x128xf32> to vector<16x128xf32>
    %131 = vector.shape_cast %128 : vector<16x128xf32> to vector<1x16x128xf32>
    tpu.vector_store %arg12[%c0_66, %c0_67, %c0_68], %131 {strides = array<i32>} : memref<1x16x128xf32, #tpu.memory_space<vmem>>, vector<1x16x128xf32>,
    return
  }
  func.func @transform_0(%arg0: i32) -> (i32, i32, i32) {
    %c0_i32 = arith.constant 0 : i32
    %c0_i32_0 = arith.constant 0 : i32
    %c0_i32_1 = arith.constant 0 : i32
    return %arg0, %c0_i32, %c0_i32_0 : i32, i32, i32
  }
  func.func @transform_1(%arg0: i32) -> (i32, i32) {
    %c0_i32 = arith.constant 0 : i32
    %c0_i32_0 = arith.constant 0 : i32
    %c0_i32_1 = arith.constant 0 : i32
    return %c0_i32, %c0_i32_0 : i32, i32
  }
  func.func @transform_2(%arg0: i32) -> (i32, i32) {
    %c0_i32 = arith.constant 0 : i32
    %c0_i32_0 = arith.constant 0 : i32
    %c0_i32_1 = arith.constant 0 : i32
    return %c0_i32, %c0_i32_0 : i32, i32
  }
  func.func @transform_3(%arg0: i32) -> (i32, i32) {
    %c0_i32 = arith.constant 0 : i32
    %c0_i32_0 = arith.constant 0 : i32
    %c0_i32_1 = arith.constant 0 : i32
    return %c0_i32, %c0_i32_0 : i32, i32
  }
  func.func @transform_4(%arg0: i32) -> (i32, i32) {
    %c0_i32 = arith.constant 0 : i32
    %c0_i32_0 = arith.constant 0 : i32
    %c0_i32_1 = arith.constant 0 : i32
    return %c0_i32, %c0_i32_0 : i32, i32
  }
  func.func @transform_5(%arg0: i32) -> (i32, i32) {
    %c0_i32 = arith.constant 0 : i32
    %c0_i32_0 = arith.constant 0 : i32
    %c0_i32_1 = arith.constant 0 : i32
    return %c0_i32, %c0_i32_0 : i32, i32
  }
  func.func @transform_6(%arg0: i32) -> (i32, i32) {
    %c0_i32 = arith.constant 0 : i32
    %c0_i32_0 = arith.constant 0 : i32
    %c0_i32_1 = arith.constant 0 : i32
    return %c0_i32, %c0_i32_0 : i32, i32
  }
  func.func @transform_7(%arg0: i32) -> (i32, i32) {
    %c0_i32 = arith.constant 0 : i32
    %c0_i32_0 = arith.constant 0 : i32
    %c0_i32_1 = arith.constant 0 : i32
    return %c0_i32, %c0_i32_0 : i32, i32
  }
  func.func @transform_8(%arg0: i32) -> (i32, i32) {
    %c0_i32 = arith.constant 0 : i32
    %c0_i32_0 = arith.constant 0 : i32
    %c0_i32_1 = arith.constant 0 : i32
    return %c0_i32, %c0_i32_0 : i32, i32
  }
  func.func @transform_9(%arg0: i32) -> (i32, i32) {
    %c0_i32 = arith.constant 0 : i32
    %c0_i32_0 = arith.constant 0 : i32
    %c0_i32_1 = arith.constant 0 : i32
    return %c0_i32, %c0_i32_0 : i32, i32
  }
  func.func @transform_10(%arg0: i32) -> (i32, i32) {
    %c0_i32 = arith.constant 0 : i32
    %c0_i32_0 = arith.constant 0 : i32
    %c0_i32_1 = arith.constant 0 : i32
    return %c0_i32, %c0_i32_0 : i32, i32
  }
  func.func @transform_11(%arg0: i32) -> (i32, i32, i32) {
    %c0_i32 = arith.constant 0 : i32
    %c0_i32_0 = arith.constant 0 : i32
    %c0_i32_1 = arith.constant 0 : i32
    return %arg0, %c0_i32, %c0_i32_0 : i32, i32, i32
  }
}

</mosaic_0001>

<bundles_post_ra>
// kernel: tpu_custom_call.1
= control target key start
LH: loop header
LB: loop body
LE: loop exit
PB: predicated region body
PF: predicated region fallthrough
CT: control target
= control target key end

     0   :  { %16 = vsyncpa [#allocation4], 0  ;;  %s1715_s0 = inlined_call_operand.vmem [shape: f32[2,16,128], index: 0, kind: input, shape index: {}]   ;;  %s1716_s1 = inlined_call_operand.vmem [shape: bf16[24,16], index: 1, kind: input, shape index: {}]   ;;  %s1717_s2 = inlined_call_operand.vmem [shape: f32[8,1], index: 2, kind: input, shape index: {}]   ;;  %s1718_s3 = inlined_call_operand.vmem [shape: bf16[24,32], index: 3, kind: input, shape index: {}]   ;;  %s1719_s4 = inlined_call_operand.vmem [shape: f32[8,1], index: 4, kind: input, shape index: {}]   ;;  %s1720_s5 = inlined_call_operand.vmem [shape: bf16[24,48], index: 5, kind: input, shape index: {}]   ;;  %s1721_s6 = inlined_call_operand.vmem [shape: f32[8,1], index: 6, kind: input, shape index: {}]   ;;  %s1722_s7 = inlined_call_operand.hbm [shape: bf16[24,64], index: 7, kind: input, shape index: {}]   ;;  %s1723_s8 = inlined_call_operand.vmem [shape: f32[8,1], index: 8, kind: input, shape index: {}]   ;;  %s1724_s9 = inlined_call_operand.vmem [shape: bf16[48,80], index: 9, kind: input, shape index: {}]   ;;  %s1725_s10 = inlined_call_operand.vmem [shape: f32[16,1], index: 10, kind: input, shape index: {}]   ;;  %s1726_s11 = inlined_call_operand.hbm [shape: f32[2,16,128], index: 11, kind: output, shape index: {}]  }
   0x1   :  { %17 = vsyncpa [#allocation5], 0 }
   0x2   :  { %19 = vsyncpa [#allocation5 + $0x1], 0  ;;  %s1495_s17 = smov 0   ;;  %s1497_s18 = smov 0  }
   0x3   :  { %s1499_s19 = smov 0   ;;  %s1501_s20 = smov 0  }
   0x4 LB: > { %s1516_s21 = sadd.s32 4294967295, %s1422_s20   ;;  %s1097_s22 = sadd.s32 4294967294, %s1422_s20   ;;  %s1422_s20 = sphi %s1501_s20, %s1736_s20   ;;  %s1418_s19 = sphi %s1499_s19, %s1735_s19   ;;  %s1414_s18 = sphi %s1497_s18, %s1734_s18   ;;  %s1410_s17 = sphi %s1495_s17, %s1733_s17  }
   0x5   : > { %s1520_s23 = sadd.s32 1, %s1422_s20   ;;  %s268_s24 = sadd.s32 1, %s1418_s19 }
   0x6   : > { %s265_s25 = ssub.s32 %s1422_s20, %s1520_s23  ;;  %p278_p0 = scmp.ne.s32.totalorder %s1418_s19, %s1414_s18 }
   0x7   : > { %p266_p1 = scmp.eq.s32.totalorder %s265_s25, 0  ;;  %p279_p2 = scmp.eq.s32.totalorder %s1516_s21, 1 }
   0x8   : > { %p284_p3 = scmp.ne.s32.totalorder %s1414_s18, %s1410_s17  ;;  %p285_p4 = scmp.eq.s32.totalorder %s1097_s22, 1 }
   0x9   : > { %s1531_s26 = scalar_select %p266_p1, %s1418_s19, %s268_s24  }
   0xa   : > { %p1533_p5 = por %p279_p2, %p278_p0  ;;  %p1537_p6 = por %p285_p4, %p284_p3 }
   0xb   : > { %1727 = sst [smem:[#allocation9_spill]] %s1531_s26  ;;  %p1098_p7 = scmp.ge.s32.totalorder %s1422_s20, 1 }
   0xc   : > { %s1729_s28 = scalar_select %p1537_p6, 1, 0 }
   0xd   : > { %p292_p8 = scmp.lt.s32.totalorder %s1422_s20, 3  ;;  %p1259_p9 = scmp.eq.s32.totalorder %s1516_s21, 0 }
   0xe   : > { %s1424_s30 = smov [#allocation3]  }
   0xf   : > { %p1544_p10 = pnand %p1098_p7, %p292_p8  ;;  %s322_s12 = sshll.u32 %s1424_s30, 4  ;;  %s323_s12 = int_to_ptr.vmem [resolvable:$true] %s322_s12 }
  0x10   : > { %s1343_s13 = scalar_lea.vmem %s323_s12, 192  ;;  %p1351_p3 = scmp.lt.s32.totalorder %s323_s12, %s323_s12 }
  0x11   : > { %p1251_p11 = pneg %p1544_p10  ;;  %p1344_p0 = scmp.ne.s32.totalorder %s323_s12, %s1343_s13 }
  0x12   : > { %p1352_p4 = scmp.lt.s32.totalorder %s1343_s13, %s1343_s13 }
  0x13   : > { %p1252_p12 = pnand %p1259_p9, %p1251_p11 }
  0x14   : > { %p1353_p6 = por %p1352_p4, %p1351_p3 }
  0x15   : > { %p1334_p13 = pneg %p1252_p12 }
  0x17   : > { %p1346_p1 = pnand %p1344_p0, %p1334_p13 }
  0x19   : > { %p1347_p2 = pneg %p1346_p1 }
  0x1b   : > { %p1354_p7 = pnand %p1353_p6, %p1347_p2 }
  0x1d   : > { %1357 = shalt.err (!%p1354_p7)
}
  0x1e   : > { %s1425_s14 = smov 64   ;;  %s1426_s15 = smov 4  }
  0x1f   : > { %1254 = dma.hbm_to_vmem [thread:$0]  (!%p1252_p12), %s1722_s7, 192, %s323_s12, [#allocation4], %s1425_s14, %s1425_s14, %s1426_s15  }
  0x20   : > { %355 = sbr.rel (%p1544_p10) target bundleno = 1810 (0x712), region = 64 }
  0x25   : > { %1401 = dma.done.wait (%p1259_p9), [#allocation4], 192  }
  0x26   : > { %1403 = vsyncadd (%p1259_p9), [#allocation4], 4294967104  ;;  %p395_p8 = scmp.lt.s32.totalorder %s1516_s21, 1  ;;  %vm444_vm0 = vcmask 130048   ;;  %v1307_v3 = vld [vmem:[%s1716_s1] sm:$0xff]   ;;  %v1427_v6 = vmov 0   ;;  %v405_v13 = vlaneseq }
  0x27   : > { %1189 = vmatprep.mubr.msk.bf16.mxu0 %vm444_vm0, %v1307_v3  ;;  %v1308_v5 = vld [vmem:[%s1716_s1 + $0x8] ss:$0 sps:$4 sm:$0xff]   ;;  %1304 = vset.pattern.permute.xlu0 %v1427_v6  ;;  %401 = vst [vmem:[#allocation2 + $0xc] sm:$0xf] %v1427_v6  ;;  %402 = vst [vmem:[#allocation2 + $0x14] sm:$0xf] %v1427_v6 }
  0x28   : > { %s396_s24 = scalar_select %p395_p8, %s1516_s21, 1  ;;  %403 = vst [vmem:[#allocation2 + $0x1c] sm:$0xf] %v1427_v6  ;;  %404 = vst [vmem:[#allocation2 + $0x24] sm:$0xf] %v1427_v6  ;;  %1305 = vset.pattern.permute.xlu1 %v1427_v6  ;;  %v1428_v7 = vmov 0.0  }
  0x29   : > { %s1430_s16 = smov 1   ;;  %v507_v11 = vld [vmem:[%s1717_s2] sm:$0xff]  ;;  %vm545_vm1 = vcmask 261120   ;;  %v406_v14 = vand.u32 127, %v405_v13  ;;  %v1312_v31 = vld [vmem:[%s1718_s3 + $0x8] ss:$0 sps:$4 sm:$0xff]  }
  0x2a   : > { %s1152_s25 = sshll.u32 %s396_s24, 4  ;;  %v1311_v12 = vld [vmem:[%s1718_s3] sm:$0xff]   ;;  %vm654_vm4 = vcmask 392192   ;;  %v1317_v53 = vld [vmem:[%s1720_s5 + $0x8] ss:$0 sps:$4 sm:$0xff]   ;;  %vm771_vm5 = vcmask 523264  }
  0x2b   : > { %s399_s26 = scalar_lea.vmem %s1715_s0, %s1152_s25  ;;  %1197 = vmatprep.mubr.msk.bf16.mxu1 %vm545_vm1, %v1311_v12  ;;  %vm407_vm2 = vcmp.ne.s32.totalorder %v406_v14, 0  ;;  %vm410_vm3 = vcmp.ne.s32.totalorder %v406_v14, 127  ;;  %v717_v34 = vld [vmem:[%s1721_s6] sm:$0xff]  ;;  %v1322_v59 = vld [vmem:[#allocation3] sm:$0xff]   ;;  %vm1431_vm6 = vmmov 0   ;;  %vm906_vm7 = vcmask 654336  }
  0x2c   : > { %v1566_v0 = vld [vmem:[%s399_s26] sm:$0xff]  ;;  %v1568_v1 = vld [vmem:[%s399_s26 + $0x8] sm:$0xff]  ;;  %s1429_s26 = smov 127   ;;  %v1589_v15 = vsel %vm407_vm2, 1.0, %v1428_v7  ;;  %v1593_v19 = vsel %vm410_vm3, 1.0, %v1428_v7  ;;  %s1155_s24 = sshll.u32 %s1516_s21, 8 }
  0x2d   : > { %v1159_v2 = vpack.c.bf16 %v1568_v1, %v1566_v0  ;;  %v608_v36 = vld [vmem:[%s1719_s4] sm:$0xff]  ;;  %s1670_s13 = scalar_lea.hbm %s1726_s11, %s1155_s24  ;;  %s1432_s21 = smov [#allocation6]  }
  0x2e   : > { %v1316_v37 = vld [vmem:[%s1720_s5] sm:$0xff]   ;;  %s1362_s14 = sshll.u32 %s1432_s21, 4  ;;  %s1363_s14 = int_to_ptr.vmem [resolvable:$false] %s1362_s14 }
  0x2f   : > { %1160 = vst [vmem:[#allocation2] sm:$0xff] %v1159_v2   ;;  %v834_v57 = vld [vmem:[%s1723_s8] sm:$0xff] }
  0x30   : > { %v989_v58 = vld [vmem:[%s1725_s10] sm:$0xff] }
  0x36   : > { %v1306_v4 = vld [vmem:[#allocation2] sm:$0xff]  }
  0x37   : > { %1187 = vmatprep.subr.bf16.mxu0 %v1306_v4  ;;  %v1310_v29 = vld [vmem:[#allocation2] sm:$0xff]  }
  0x38   : > { %1188 = vmatpush3.bf16.msra.mxu0 %v1306_v4  ;;  %v1315_v52 = vld [vmem:[#allocation2] sm:$0xff]  }
  0x39   : > { %1223 = vmatprep.subr.bf16.mxu0 %v1428_v7  ;;  %v1321_v14 = vld [vmem:[#allocation2] sm:$0xff]  }
  0x3b   : > { %1190 = vmatmul.mubr.msk.bf16.vlgmr.msra.gmra.mxu0 %vm444_vm0, %v1308_v5 }
  0x3c   : > { %1233 = vmatprep.mubr.msk.bf16.mxu0 %vm1431_vm6, %v1428_v7 }
  0xfb   : > { %v1191_v8 = vpop.f32.mrf.mxu0 }
  0xfc   : > { %502 = vrot.lane.b32.xlu1 %v1191_v8, %s1429_s26 }
  0xfd   : > { %v485_v9 = vpop.f32.mrf.mxu0 }
  0xfe   : > { %499 = vrot.lane.b32.xlu0 %v485_v9, %s1430_s16 }
  0xff   : > { %v1192_v10 = vpop.f32.mrf.mxu0 }
 0x101   : > { %v488_v18 = vpop.f32.mrf.mxu0 }
 0x102   : > { %510 = vperm.xlu0 %1304, %v507_v11  }
 0x16e   : > { %v503_v20 = vpop.permute.xlu1 %502 }
 0x16f   : > { %v504_v22 = vmul.f32 %v1593_v19, %v503_v20 }
 0x170   : > { %v500_v16 = vpop.permute.xlu0 %499 }
 0x171   : > { %v501_v17 = vmul.f32 %v1589_v15, %v500_v16  ;;  %v1323_v16 = vld [vmem:[#allocation3 + $0x8] ss:$0 sps:$4 sm:$0xff]  }
 0x173   : > { %v505_v21 = vadd.f32 %v501_v17, %v488_v18 }
 0x175   : > { %v506_v23 = vadd.f32 %v505_v21, %v504_v22  ;;  %v990_v21 = vld [vmem:[%s1725_s10 + $0x8] sm:$0xff] }
 0x17d   : > { %v511_v24 = vpop.permute.xlu0 %510 }
 0x17e   : > { %v513_v25 = vadd.f32 %v511_v24, %v506_v23 }
 0x180   : > { %v514_v26 = vmul.f32 0.2, %v513_v25 }
 0x182   : > { %v515_v27 = vmax.f32 %v513_v25, %v514_v26 }
 0x184   : > { %v516_v28 = vpack.c.bf16 %v515_v27, %v515_v27 }
 0x186   : > { %517 = vst [vmem:[#allocation2 + $0x8] sm:$0xf] %v516_v28 }
 0x18d   : > { %v1309_v30 = vld [vmem:[#allocation2 + $0x8] sm:$0xff]  }
 0x18e   : > { %1193 = vmatprep.subr.bf16.mxu1 %v1309_v30  ;;  %v1314_v51 = vld [vmem:[#allocation2 + $0x8] sm:$0xff]  }
 0x18f   : > { %1194 = vmatpush3.bf16.msra.mxu1 %v1309_v30  ;;  %v1320_v13 = vld [vmem:[#allocation2 + $0x8] sm:$0xff]  }
 0x190   : > { %1195 = vmatprep.subr.bf16.mxu1 %v1310_v29 }
 0x193   : > { %1196 = vmatpush3.bf16.msra.mxu1 %v1310_v29 }
 0x196   : > { %1198 = vmatmul.mubr.msk.bf16.vlgmr.msra.gmra.mxu1 %vm545_vm1, %v1312_v31 }
 0x197   : > { %1207 = vmatprep.mubr.msk.bf16.mxu1 %vm654_vm4, %v1316_v37  ;;  %v1327_v37 = vld [vmem:[#allocation2 + $0x8] sm:$0xff]  }
 0x256   : > { %v1199_v32 = vpop.f32.mrf.mxu1 }
 0x257   : > { %603 = vrot.lane.b32.xlu0 %v1199_v32, %s1429_s26 }
 0x258   : > { %v586_v33 = vpop.f32.mrf.mxu1 }
 0x259   : > { %600 = vrot.lane.b32.xlu1 %v586_v33, %s1430_s16 }
 0x25a   : > { %v1200_v35 = vpop.f32.mrf.mxu1 }
 0x25b   : > { %720 = vperm.xlu0 %1304, %v717_v34  }
 0x25c   : > { %v589_v40 = vpop.f32.mrf.mxu1 }
 0x25d   : > { %611 = vperm.xlu1 %1305, %v608_v36  }
 0x2c9   : > { %v604_v41 = vpop.permute.xlu0 %603 }
 0x2ca   : > { %v605_v43 = vmul.f32 %v1593_v19, %v604_v41  ;;  %v1331_v41 = vld [vmem:[%s1724_s9 + $0x10] sm:$0xff]  }
 0x2cb   : > { %v601_v38 = vpop.permute.xlu1 %600 }
 0x2cc   : > { %v602_v39 = vmul.f32 %v1589_v15, %v601_v38  ;;  %v1328_v38 = vld [vmem:[#allocation2] sm:$0xff]  }
 0x2ce   : > { %v606_v42 = vadd.f32 %v602_v39, %v589_v40  ;;  %v1329_v39 = vld [vmem:[%s1724_s9] sm:$0xff]   ;;  %v1330_v40 = vld [vmem:[%s1724_s9 + $0x8] sm:$0xff]  }
 0x2d0   : > { %v607_v44 = vadd.f32 %v606_v42, %v605_v43 }
 0x2d6   : > { %v721_v5 = vpop.permute.xlu0 %720 }
 0x2d8   : > { %v612_v45 = vpop.permute.xlu1 %611 }
 0x2d9   : > { %v614_v46 = vadd.f32 %v612_v45, %v607_v44 }
 0x2db   : > { %v615_v47 = vmul.f32 0.2, %v614_v46 }
 0x2dd   : > { %v616_v48 = vmax.f32 %v614_v46, %v615_v47 }
 0x2df   : > { %v617_v49 = vpack.c.bf16 %v616_v48, %v616_v48 }
 0x2e1   : > { %618 = vst [vmem:[#allocation2 + $0x10] sm:$0xf] %v617_v49 }
 0x2e8   : > { %v1313_v50 = vld [vmem:[#allocation2 + $0x10] sm:$0xff]  }
 0x2e9   : > { %1201 = vmatprep.subr.bf16.mxu1 %v1313_v50  ;;  %v1319_v12 = vld [vmem:[#allocation2 + $0x10] sm:$0xff]  }
 0x2ea   : > { %1202 = vmatpush3.bf16.msra.mxu1 %v1313_v50  ;;  %v1326_v36 = vld [vmem:[#allocation2 + $0x10] sm:$0xff]  }
 0x2eb   : > { %1203 = vmatprep.subr.bf16.mxu1 %v1314_v51 }
 0x2ee   : > { %1204 = vmatpush3.bf16.msra.mxu1 %v1314_v51 }
 0x2ef   : > { %1205 = vmatprep.subr.bf16.mxu1 %v1315_v52 }
 0x2f2   : > { %1206 = vmatpush3.bf16.msra.mxu1 %v1315_v52 }
 0x2f5   : > { %1208 = vmatmul.mubr.msk.bf16.vlgmr.msra.gmra.mxu1 %vm654_vm4, %v1317_v53 }
 0x2f6   : > { %1219 = vmatprep.mubr.msk.bf16.mxu1 %vm771_vm5, %v1322_v59 }
 0x3b5   : > { %v1209_v54 = vpop.f32.mrf.mxu1 }
 0x3b7   : > { %v695_v55 = vpop.f32.mrf.mxu1 }
 0x3b8   : > { %709 = vrot.lane.b32.xlu1 %v695_v55, %s1430_s16 }
 0x3b9   : > { %v1210_v56 = vpop.f32.mrf.mxu1 }
 0x3bb   : > { %v698_v62 = vpop.f32.mrf.mxu1 }
 0x3bc   : > { %712 = vrot.lane.b32.xlu1 %v1209_v54, %s1429_s26 }
 0x3c0   : > { %837 = vperm.xlu1 %1305, %v834_v57  }
 0x3c4   : > { %993 = vperm.xlu1 %1305, %v989_v58  }
 0x42a   : > { %v710_v60 = vpop.permute.xlu1 %709 }
 0x42b   : > { %v711_v61 = vmul.f32 %v1589_v15, %v710_v60 }
 0x42d   : > { %v715_v2 = vadd.f32 %v711_v61, %v698_v62 }
 0x42e   : > { %v713_v63 = vpop.permute.xlu1 %712 }
 0x42f   : > { %v714_v3 = vmul.f32 %v1593_v19, %v713_v63 }
 0x431   : > { %v716_v4 = vadd.f32 %v715_v2, %v714_v3 }
 0x433   : > { %v723_v6 = vadd.f32 %v721_v5, %v716_v4 }
 0x435   : > { %v724_v8 = vmul.f32 0.2, %v723_v6 }
 0x437   : > { %v725_v9 = vmax.f32 %v723_v6, %v724_v8 }
 0x439   : > { %v726_v10 = vpack.c.bf16 %v725_v9, %v725_v9 }
 0x43b   : > { %727 = vst [vmem:[#allocation2 + $0x18] sm:$0xf] %v726_v10  ;;  %v838_v29 = vpop.permute.xlu1 %837 }
 0x43f   : > { %v994_v53 = vpop.permute.xlu1 %993 }
 0x442   : > { %v1318_v11 = vld [vmem:[#allocation2 + $0x18] sm:$0xff]  }
 0x443   : > { %1211 = vmatprep.subr.bf16.mxu1 %v1318_v11  ;;  %v1325_v35 = vld [vmem:[#allocation2 + $0x18] sm:$0xff]  }
 0x444   : > { %1212 = vmatpush3.bf16.msra.mxu1 %v1318_v11 }
 0x445   : > { %1213 = vmatprep.subr.bf16.mxu1 %v1319_v12 }
 0x448   : > { %1214 = vmatpush3.bf16.msra.mxu1 %v1319_v12 }
 0x449   : > { %1215 = vmatprep.subr.bf16.mxu1 %v1320_v13 }
 0x44c   : > { %1216 = vmatpush3.bf16.msra.mxu1 %v1320_v13 }
 0x44d   : > { %1217 = vmatprep.subr.bf16.mxu1 %v1321_v14 }
 0x450   : > { %1218 = vmatpush3.bf16.msra.mxu1 %v1321_v14 }
 0x453   : > { %1220 = vmatmul.mubr.msk.bf16.vlgmr.msra.gmra.mxu1 %vm771_vm5, %v1323_v16 }
 0x513   : > { %v1221_v17 = vpop.f32.mrf.mxu1 }
 0x515   : > { %v812_v18 = vpop.f32.mrf.mxu1 }
 0x516   : > { %826 = vrot.lane.b32.xlu0 %v812_v18, %s1430_s16 }
 0x517   : > { %v1222_v20 = vpop.f32.mrf.mxu1 }
 0x519   : > { %v815_v24 = vpop.f32.mrf.mxu1 }
 0x51a   : > { %829 = vrot.lane.b32.xlu0 %v1221_v17, %s1429_s26 }
 0x51e   : > { %998 = vperm.xlu0 %1304, %v990_v21  }
 0x588   : > { %v827_v22 = vpop.permute.xlu0 %826 }
 0x589   : > { %v828_v23 = vmul.f32 %v1589_v15, %v827_v22 }
 0x58b   : > { %v832_v26 = vadd.f32 %v828_v23, %v815_v24 }
 0x58c   : > { %v830_v25 = vpop.permute.xlu0 %829 }
 0x58d   : > { %v831_v27 = vmul.f32 %v1593_v19, %v830_v25 }
 0x58f   : > { %v833_v28 = vadd.f32 %v832_v26, %v831_v27 }
 0x591   : > { %v840_v30 = vadd.f32 %v838_v29, %v833_v28 }
 0x593   : > { %v841_v31 = vmul.f32 0.2, %v840_v30 }
 0x595   : > { %v842_v32 = vmax.f32 %v840_v30, %v841_v31 }
 0x597   : > { %v843_v33 = vpack.c.bf16 %v842_v32, %v842_v32 }
 0x599   : > { %844 = vst [vmem:[#allocation2 + $0x20] sm:$0xf] %v843_v33  ;;  %v999_v54 = vpop.permute.xlu0 %998 }
 0x5a0   : > { %v1324_v34 = vld [vmem:[#allocation2 + $0x20] sm:$0xff]  }
 0x5a1   : > { %1224 = vmatpush3.bf16.msra.mxu0 %v1324_v34 }
 0x5a2   : > { %1225 = vmatprep.subr.bf16.mxu0 %v1428_v7 }
 0x5a5   : > { %1226 = vmatpush3.bf16.msra.mxu0 %v1325_v35 }
 0x5a6   : > { %1227 = vmatprep.subr.bf16.mxu0 %v1428_v7 }
 0x5a9   : > { %1228 = vmatpush3.bf16.msra.mxu0 %v1326_v36 }
 0x5aa   : > { %1229 = vmatprep.subr.bf16.mxu0 %v1428_v7 }
 0x5ad   : > { %1230 = vmatpush3.bf16.msra.mxu0 %v1327_v37 }
 0x5ae   : > { %1231 = vmatprep.subr.bf16.mxu0 %v1428_v7 }
 0x5b1   : > { %1232 = vmatpush3.bf16.msra.mxu0 %v1328_v38 }
 0x5b4   : > { %1234 = vmatmul.mubr.msk.bf16.vlgmr.msra.gmra.mxu0 %vm906_vm7, %v1329_v39 }
 0x5b5   : > { %1237 = vmatprep.mubr.msk.bf16.mxu0 %vm1431_vm6, %v1428_v7 }
 0x5bc   : > { %1238 = vmatmul.mubr.msk.bf16.gmra.mxu0 %vm906_vm7, %v1330_v40 }
 0x5bd   : > { %1241 = vmatprep.mubr.msk.bf16.mxu0 %vm1431_vm6, %v1428_v7 }
 0x5c4   : > { %1242 = vmatmul.mubr.msk.bf16.gmra.mxu0 %vm906_vm7, %v1331_v41 }
 0x674   : > { %v950_v42 = vpop.f32.mrf.mxu0 }
 0x675   : > { %973 = vrot.lane.b32.xlu1 %v950_v42, %s1430_s16 }
 0x676   : > { %v1235_v43 = vpop.f32.mrf.mxu0 }
 0x678   : > { %v953_v44 = vpop.f32.mrf.mxu0 }
 0x679   : > { %975 = vrot.lane.b32.xlu0 %v953_v44, %s1430_s16  ;;  %s392_s16 = sand.u32 1, %s1414_s18  }
 0x67a   : > { %v1236_v45 = vpop.f32.mrf.mxu0  ;;  %s1103_s15 = sshll.u32 %s392_s16, 4  ;;  %s1675_s29 = scalar_lea.sflag [#allocation5], %s392_s16 }
 0x67c   : > { %v958_v46 = vpop.f32.mrf.mxu0 }
 0x67e   : > { %v1239_v47 = vpop.f32.mrf.mxu0 }
 0x680   : > { %v961_v48 = vpop.f32.mrf.mxu0 }
 0x682   : > { %v1240_v49 = vpop.f32.mrf.mxu0 }
 0x684   : > { %v966_v50 = vpop.f32.mrf.mxu0 }
 0x685   : > { %979 = vrot.lane.b32.xlu1 %v966_v50, %s1429_s26 }
 0x686   : > { %v1243_v7 = vpop.f32.mrf.mxu0 }
 0x688   : > { %v969_v51 = vpop.f32.mrf.mxu0 }
 0x689   : > { %981 = vrot.lane.b32.xlu0 %v969_v51, %s1429_s26  ;;  %s394_s26 = scalar_lea.vmem [#allocation6], %s1103_s15  ;;  %s1364_s15 = scalar_lea.vmem %s1363_s14, 512 }
 0x68a   : > { %v1244_v52 = vpop.f32.mrf.mxu0  ;;  %s1023_s22 = sshll.u32 %s394_s26, 4  ;;  %s1672_s22 = int_to_ptr.vmem [resolvable:$true] %s1023_s22 }
 0x68b   : > { %s1358_s12 = scalar_lea.vmem %s1672_s22, 256  ;;  %p1365_p11 = scmp.lt.s32.totalorder %s1672_s22, %s1363_s14 }
 0x68c   : > { %p1359_p6 = scmp.ne.s32.totalorder %s1672_s22, %s1358_s12  ;;  %p1366_p12 = scmp.lt.s32.totalorder %s1364_s15, %s1358_s12 }
 0x68e   : > { %p1360_p9 = pnand %p1359_p6, %p1533_p5  ;;  %p1367_p13 = por %p1366_p12, %p1365_p11 }
 0x690   : > { %p1361_p10 = pneg %p1360_p9 }
 0x692   : > { %p1368_p0 = pnand %p1367_p13, %p1361_p10 }
 0x6e7   : > { %v974_v55 = vpop.permute.xlu1 %973 }
 0x6e8   : > { %v977_v56 = vmul.f32 %v1589_v15, %v974_v55 }
 0x6ea   : > { %v985_v59 = vadd.f32 %v977_v56, %v958_v46 }
 0x6eb   : > { %v976_v57 = vpop.permute.xlu0 %975 }
 0x6ec   : > { %v978_v60 = vmul.f32 %v1589_v15, %v976_v57 }
 0x6ee   : > { %v986_v2 = vadd.f32 %v978_v60, %v961_v48 }
 0x6f7   : > { %v980_v58 = vpop.permute.xlu1 %979 }
 0x6f8   : > { %v983_v61 = vmul.f32 %v1593_v19, %v980_v58 }
 0x6fa   : > { %v987_v62 = vadd.f32 %v985_v59, %v983_v61 }
 0x6fb   : > { %v982_v63 = vpop.permute.xlu0 %981 }
 0x6fc   : > { %v1001_v3 = vadd.f32 %v994_v53, %v987_v62  ;;  %v984_v4 = vmul.f32 %v1593_v19, %v982_v63 }
 0x6fe   : > { %v1005_v5 = vadd.f32 %v1001_v3, %v1566_v0  ;;  %v988_v6 = vadd.f32 %v986_v2, %v984_v4 }
 0x700   : > { %1007 = vst [vmem:[%s394_s26] sm:$0xff] %v1005_v5  ;;  %v1002_v8 = vadd.f32 %v999_v54, %v988_v6 }
 0x702   : > { %v1006_v15 = vadd.f32 %v1002_v8, %v1568_v1 }
 0x704   : > { %1008 = vst [vmem:[%s394_s26 + $0x8] sm:$0xff] %v1006_v15 }
 0x705   : > { %1371 = shalt.err (!%p1368_p0)
}
 0x706   : > { %s1372_s16 = scalar_lea.hbm %s1670_s13, 256  ;;  %s1376_s25 = scalar_lea.hbm %s1726_s11, 512 }
 0x707   : > { %p1373_p1 = scmp.ne.s32.totalorder %s1670_s13, %s1372_s16  ;;  %p1377_p4 = scmp.lt.s32.totalorder %s1670_s13, %s1726_s11 }
 0x708   : > { %p1378_p7 = scmp.lt.s32.totalorder %s1376_s25, %s1372_s16 }
 0x709   : > { %p1374_p2 = pnand %p1373_p1, %p1533_p5 }
 0x70a   : > { %p1379_p8 = por %p1378_p7, %p1377_p4 }
 0x70b   : > { %p1375_p3 = pneg %p1374_p2 }
 0x70d   : > { %p1380_p6 = pnand %p1379_p8, %p1375_p3 }
 0x70f   : > { %1383 = shalt.err (!%p1380_p6)
}
 0x710   : > { %s1433_s12 = smov 128   ;;  %s1434_s14 = smov 8  }
 0x711   : > { %1249 = dma.vmem_to_hbm [thread:$0]  (%p1533_p5), %s1672_s22, 256, %s1670_s13, %s1675_s29, %s1433_s12, %s1433_s12, %s1434_s14  }
 0x712 PF: > { %p1261_p9 = scmp.ge.s32.totalorder %s1422_s20, 2  ;;  %s1038_s15 = sand.u32 1, %s1410_s17  }
 0x713   : > { %p1731_p10 = scmp.ne.s32.totalorder %s1729_s28, 0  ;;  %s1039_s16 = scalar_lea.sflag [#allocation5], %s1038_s15 }
 0x715   : > { %p1256_p11 = pnand %p1261_p9, %p1731_p10 }
 0x717   : > { %p1257_p12 = pneg %p1256_p11 }
 0x719   : > { %1405 = dma.done.wait (%p1257_p12), %s1039_s16, 256  }
 0x71a   : > { %1407 = vsyncadd (%p1257_p12), %s1039_s16, 4294967040  ;;  %s1732_s26 = sld [smem:[#allocation9_spill]]  ;;  %p22_p13 = scmp.ge.s32.totalorder %s1520_s23, 4  }
 0x71b   : > { %s1733_s17 = smov %s1414_s18  ;;  %s1734_s18 = smov %s1418_s19 }
 0x71c   : > { %s1736_s20 = smov %s1520_s23  ;;  %24 = sbr.rel (!%p22_p13) target bundleno = 4 (0x4), region = 104 }
 0x720   : > { %s1735_s19 = smov %s1732_s26 }
 0x721   :  { %1044 = vsyncpa [#allocation4], 1 }
 0x722   :  { %1046 = vsyncpa [#allocation4 + $0x1], 1 }
 0x723   :  { %1047 = vsyncpa [#allocation5], 1 }
 0x724   :  { %1049 = vsyncpa [#allocation5 + $0x1], 1 }

</bundles_post_ra>
